<compile_context>
chip_gen: v6e
topology: v6e:2x2x1
jax: 0.10.0
libtpu: 0.0.40
codegen_flags: <defaults>
</compile_context>

<pallas_src>
import jax
import jax.numpy as jnp
from jax.experimental import pallas as pl
from jax.experimental.pallas import tpu as pltpu


def _smooth_loss_kernel(disp_ref, img_ref, sx_ref, sy_ref, carry_d_ref, carry_i_ref):
    # disp_ref: (1, Cd, TH, W) native dtype    img_ref: (1, Ci, TH, W) native dtype
    # sx_ref / sy_ref: (1, 1, 1) f32 per-batch accumulators (block revisited over t)
    # carry_d / carry_i: (Cd, W) / (Ci, W) f32 scratch -- last row of previous H-tile
    t = pl.program_id(1)

    disp = disp_ref[0]          # (Cd, TH, W) native dtype
    img = img_ref[0]            # (Ci, TH, W) native dtype
    th = disp.shape[1]

    row0_d = disp[:, 0, :].astype(jnp.float32)        # (Cd, W)
    row0_i = img[:, 0, :].astype(jnp.float32)         # (Ci, W)

    @pl.when(t == 0)
    def _():
        sx_ref[...] = jnp.zeros(sx_ref.shape, sx_ref.dtype)
        sy_ref[...] = jnp.zeros(sy_ref.shape, sy_ref.dtype)
        # Global row 0 has no predecessor: seed the carry with row 0 itself so the
        # seam term below is exactly zero for the first tile of every batch element.
        carry_d_ref[...] = row0_d
        carry_i_ref[...] = row0_i

    # ---------- x direction: |x[:, :, c+1] - x[:, :, c]| for c = 0 .. W-2 ----------
    gdx = jnp.sum(jnp.abs(disp[:, :, 1:].astype(jnp.float32)
                          - disp[:, :, :-1].astype(jnp.float32)), axis=0)   # (TH, W-1)
    gix = jnp.mean(jnp.abs(img[:, :, 1:].astype(jnp.float32)
                           - img[:, :, :-1].astype(jnp.float32)), axis=0)   # (TH, W-1)
    sx_t = jnp.sum(gdx * jnp.exp(-gix), keepdims=True)                      # (1, 1)

    # ---------- y direction: in-tile pairs |x[:, r+1, :] - x[:, r, :]| ----------
    gdy = jnp.sum(jnp.abs(disp[:, 1:, :].astype(jnp.float32)
                          - disp[:, :-1, :].astype(jnp.float32)), axis=0)   # (TH-1, W)
    giy = jnp.mean(jnp.abs(img[:, 1:, :].astype(jnp.float32)
                           - img[:, :-1, :].astype(jnp.float32)), axis=0)   # (TH-1, W)
    sy_t = jnp.sum(gdy * jnp.exp(-giy), keepdims=True)                      # (1, 1)

    # ---------- y seam: this tile's row 0 vs. previous tile's last row (carry) ----------
    gd0 = jnp.sum(jnp.abs(row0_d - carry_d_ref[...]), axis=0, keepdims=True)   # (1, W)
    gi0 = jnp.mean(jnp.abs(row0_i - carry_i_ref[...]), axis=0, keepdims=True)  # (1, W)
    sy_s = jnp.sum(gd0 * jnp.exp(-gi0), keepdims=True)                          # (1, 1)

    # Scalar accumulation into the resident per-batch output block.
    sx_ref[...] += sx_t[None]                 # (1, 1, 1)
    sy_ref[...] += (sy_t + sy_s)[None]        # (1, 1, 1)

    # Carry this tile's last row into the next grid step.
    carry_d_ref[...] = disp[:, th - 1, :].astype(jnp.float32)
    carry_i_ref[...] = img[:, th - 1, :].astype(jnp.float32)


def _pick_tile_h(H, W, Cd, Ci, disp_dtype, img_dtype, target_bytes=4 << 20):
    """Largest H-tile (native-sublane multiple, divisor of H) whose combined input
    block is ~target_bytes (big tiles amortize the ~0.35us per-step overhead while
    the in-kernel f32 temporaries stay well inside a 48 MiB VMEM budget)."""
    itemsizes = (disp_dtype.itemsize, img_dtype.itemsize)
    granule = max(8, 32 // min(itemsizes))   # 8 for f32, 16 for bf16, 32 for int8/fp8
    if H % granule != 0:
        # TODO(synk): pad H in the wrapper (or mask a tail tile) instead of a full-H
        # block; a full-extent block is a VMEM hazard on v7x for very tall images.
        return H
    row_bytes = (Cd * itemsizes[0] + Ci * itemsizes[1]) * W
    th = (target_bytes // max(row_bytes, 1)) // granule * granule
    th = max(granule, min(th, H))
    while th > granule and H % th != 0:
        th -= granule
    return th if H % th == 0 else H


def smooth_loss(disp, img, *, tile_h=None):
    """Pallas equivalent of SmoothLoss.forward(disp, img)."""
    B, Cd, H, W = disp.shape
    Bi, Ci, Hi, Wi = img.shape
    assert (B, H, W) == (Bi, Hi, Wi)

    if tile_h is None:
        tile_h = _pick_tile_h(H, W, Cd, Ci, disp.dtype, img.dtype)
    assert H % tile_h == 0
    n_tiles = H // tile_h

    sx, sy = pl.pallas_call(
        _smooth_loss_kernel,
        out_shape=(
            jax.ShapeDtypeStruct((B, 1, 1), jnp.float32),
            jax.ShapeDtypeStruct((B, 1, 1), jnp.float32),
        ),
        grid=(B, n_tiles),
        in_specs=[
            pl.BlockSpec((1, Cd, tile_h, W), lambda b, t: (b, 0, t, 0)),
            pl.BlockSpec((1, Ci, tile_h, W), lambda b, t: (b, 0, t, 0)),
        ],
        out_specs=(
            pl.BlockSpec((1, 1, 1), lambda b, t: (b, 0, 0)),
            pl.BlockSpec((1, 1, 1), lambda b, t: (b, 0, 0)),
        ),
        scratch_shapes=[
            pltpu.VMEM((Cd, W), jnp.float32),   # disp row carry (previous tile's last row)
            pltpu.VMEM((Ci, W), jnp.float32),   # img row carry
        ],
        compiler_params=pltpu.CompilerParams(
            # Batch axis is embarrassingly parallel (per-batch outputs, scratch and
            # accumulators re-initialised at t==0); H-tile axis carries the seam.
            dimension_semantics=("parallel", "arbitrary"),
            vmem_limit_bytes=48 * 1024 * 1024,
        ),
    )(disp, img)   # inputs stay in their native dtype in HBM (no wrapper up-cast)

    # .mean() divisors of the reference gradients
    n_x = B * Cd * H * (W - 1)
    n_y = B * Cd * (H - 1) * W
    return jnp.sum(sx) / n_x + jnp.sum(sy) / n_y


def _reference_smooth_loss(disp, img):
    """Pure-JAX reference mirroring the PyTorch module."""
    gdx = jnp.abs(disp[:, :, :, :-1] - disp[:, :, :, 1:])
    gdy = jnp.abs(disp[:, :, :-1, :] - disp[:, :, 1:, :])
    gix = jnp.mean(jnp.abs(img[:, :, :, :-1] - img[:, :, :, 1:]), axis=1, keepdims=True)
    giy = jnp.mean(jnp.abs(img[:, :, :-1, :] - img[:, :, 1:, :]), axis=1, keepdims=True)
    gdx = gdx * jnp.exp(-gix)
    gdy = gdy * jnp.exp(-giy)
    return gdx.mean() + gdy.mean()


if __name__ == "__main__":
    key = jax.random.PRNGKey(0)
    k_disp, k_img = jax.random.split(key)

    B, H, W = 2, 16, 16
    disp = jax.random.uniform(k_disp, (B, 1, H, W), dtype=jnp.float32)   # disparity map
    img = jax.random.uniform(k_img, (B, 3, H, W), dtype=jnp.float32)     # RGB image

    # f32 inputs, explicit H-tiling (exercises the cross-tile seam/carry path).
    out = jax.block_until_ready(smooth_loss(disp, img, tile_h=8))
    ref = _reference_smooth_loss(disp, img)
    assert jnp.allclose(out, ref, rtol=1e-5, atol=1e-5), (out, ref)

    # bf16 inputs stay bf16 in HBM (half the DMA bytes); kernel casts to f32 in VMEM.
    disp_bf = disp.astype(jnp.bfloat16)
    img_bf = img.astype(jnp.bfloat16)
    out_bf = jax.block_until_ready(smooth_loss(disp_bf, img_bf))
    ref_bf = _reference_smooth_loss(disp_bf.astype(jnp.float32), img_bf.astype(jnp.float32))
    assert jnp.allclose(out_bf, ref_bf, rtol=1e-4, atol=1e-4), (out_bf, ref_bf)

    print("KERNEL_OK")
</pallas_src>

<mosaic_0001>
module attributes {stable_mosaic.version = 11 : i64} {
  func.func @_smooth_loss_kernel(%arg0: i32, %arg1: i32, %arg2: memref<1x1x8x16xf32, #tpu.memory_space<vmem>>, %arg3: memref<1x3x8x16xf32, #tpu.memory_space<vmem>>, %arg4: memref<1x1x1xf32, #tpu.memory_space<vmem>>, %arg5: memref<1x1x1xf32, #tpu.memory_space<vmem>>, %arg6: memref<1x16xf32, #tpu.memory_space<vmem>>, %arg7: memref<3x16xf32, #tpu.memory_space<vmem>>) attributes {dimension_semantics = [#tpu.dimension_semantics<parallel>, #tpu.dimension_semantics<arbitrary>], iteration_bounds = array<i64: 2, 2>, scalar_prefetch = 0 : i64, scratch_operands = 2 : i64, tpu.core_type = #tpu.core_type<tc>, window_params = [{transform_indices = @transform_0, window_bounds = array<i64: 1, 1, 8, 16>}, {transform_indices = @transform_1, window_bounds = array<i64: 1, 3, 8, 16>}, {transform_indices = @transform_2, window_bounds = array<i64: 1, 1, 1>}, {transform_indices = @transform_3, window_bounds = array<i64: 1, 1, 1>}]} {
    %c0 = arith.constant 0 : index
    %c0_0 = arith.constant 0 : index
    %c0_1 = arith.constant 0 : index
    %c0_2 = arith.constant 0 : index
    %0 = vector.load %arg2[%c0, %c0_0, %c0_1, %c0_2] : memref<1x1x8x16xf32, #tpu.memory_space<vmem>>, vector<1x1x8x16xf32>
    %1 = vector.shape_cast %0 : vector<1x1x8x16xf32> to vector<1x8x16xf32>
    %c0_3 = arith.constant 0 : index
    %c0_4 = arith.constant 0 : index
    %c0_5 = arith.constant 0 : index
    %c0_6 = arith.constant 0 : index
    %2 = vector.load %arg3[%c0_3, %c0_4, %c0_5, %c0_6] : memref<1x3x8x16xf32, #tpu.memory_space<vmem>>, vector<1x3x8x16xf32>
    %3 = vector.shape_cast %2 : vector<1x3x8x16xf32> to vector<3x8x16xf32>
    %4 = vector.extract_strided_slice %1 {offsets = [0, 0, 0], sizes = [1, 1, 16], strides = [1, 1, 1]} : vector<1x8x16xf32> to vector<1x1x16xf32>
    %5 = vector.shape_cast %4 : vector<1x1x16xf32> to vector<1x16xf32>
    %6 = vector.extract_strided_slice %3 {offsets = [0, 0, 0], sizes = [3, 1, 16], strides = [1, 1, 1]} : vector<3x8x16xf32> to vector<3x1x16xf32>
    %7 = vector.shape_cast %6 : vector<3x1x16xf32> to vector<3x16xf32>
    %c0_i32 = arith.constant 0 : i32
    %8 = arith.cmpi eq, %arg1, %c0_i32 : i32
    %9 = arith.extui %8 : i1 to i32
    %c0_i32_7 = arith.constant 0 : i32
    %10 = arith.cmpi ne, %9, %c0_i32_7 : i32
    scf.if %10 {
      %cst_42 = arith.constant 0.000000e+00 : f32
      %89 = vector.broadcast %cst_42 : f32 to vector<1x1x1xf32>
      %c0_43 = arith.constant 0 : index
      %c0_44 = arith.constant 0 : index
      %c0_45 = arith.constant 0 : index
      %90 = vector.load %arg4[%c0_43, %c0_44, %c0_45] : memref<1x1x1xf32, #tpu.memory_space<vmem>>, vector<1x1x1xf32>
      tpu.vector_store %arg4[%c0_43, %c0_44, %c0_45], %89 {strides = array<i32>} : memref<1x1x1xf32, #tpu.memory_space<vmem>>, vector<1x1x1xf32>,
      %cst_46 = arith.constant 0.000000e+00 : f32
      %91 = vector.broadcast %cst_46 : f32 to vector<1x1x1xf32>
      %c0_47 = arith.constant 0 : index
      %c0_48 = arith.constant 0 : index
      %c0_49 = arith.constant 0 : index
      %92 = vector.load %arg5[%c0_47, %c0_48, %c0_49] : memref<1x1x1xf32, #tpu.memory_space<vmem>>, vector<1x1x1xf32>
      tpu.vector_store %arg5[%c0_47, %c0_48, %c0_49], %91 {strides = array<i32>} : memref<1x1x1xf32, #tpu.memory_space<vmem>>, vector<1x1x1xf32>,
      %c0_50 = arith.constant 0 : index
      %c0_51 = arith.constant 0 : index
      %93 = vector.load %arg6[%c0_50, %c0_51] : memref<1x16xf32, #tpu.memory_space<vmem>>, vector<1x16xf32>
      tpu.vector_store %arg6[%c0_50, %c0_51], %5 {strides = array<i32>} : memref<1x16xf32, #tpu.memory_space<vmem>>, vector<1x16xf32>,
      %c0_52 = arith.constant 0 : index
      %c0_53 = arith.constant 0 : index
      %94 = vector.load %arg7[%c0_52, %c0_53] : memref<3x16xf32, #tpu.memory_space<vmem>>, vector<3x16xf32>
      tpu.vector_store %arg7[%c0_52, %c0_53], %7 {strides = array<i32>} : memref<3x16xf32, #tpu.memory_space<vmem>>, vector<3x16xf32>,
    } else {
    }
    %11 = vector.extract_strided_slice %1 {offsets = [0, 0, 1], sizes = [1, 8, 15], strides = [1, 1, 1]} : vector<1x8x16xf32> to vector<1x8x15xf32>
    %12 = vector.extract_strided_slice %1 {offsets = [0, 0, 0], sizes = [1, 8, 15], strides = [1, 1, 1]} : vector<1x8x16xf32> to vector<1x8x15xf32>
    %13 = arith.subf %11, %12 : vector<1x8x15xf32>
    %14 = math.absf %13 : vector<1x8x15xf32>
    %cst = arith.constant dense<0.000000e+00> : vector<8x15xf32>
    %15 = vector.multi_reduction <add>, %14, %cst [0] : vector<1x8x15xf32> to vector<8x15xf32>
    %16 = vector.extract_strided_slice %3 {offsets = [0, 0, 1], sizes = [3, 8, 15], strides = [1, 1, 1]} : vector<3x8x16xf32> to vector<3x8x15xf32>
    %17 = vector.extract_strided_slice %3 {offsets = [0, 0, 0], sizes = [3, 8, 15], strides = [1, 1, 1]} : vector<3x8x16xf32> to vector<3x8x15xf32>
    %18 = arith.subf %16, %17 : vector<3x8x15xf32>
    %19 = math.absf %18 : vector<3x8x15xf32>
    %cst_8 = arith.constant dense<0.000000e+00> : vector<8x15xf32>
    %20 = vector.multi_reduction <add>, %19, %cst_8 [0] : vector<3x8x15xf32> to vector<8x15xf32>
    %cst_9 = arith.constant 3.000000e+00 : f32
    %21 = vector.broadcast %cst_9 : f32 to vector<8x15xf32>
    %22 = arith.divf %20, %21 : vector<8x15xf32>
    %cst_10 = arith.constant 0.000000e+00 : f32
    %23 = vector.broadcast %cst_10 : f32 to vector<8x15xf32>
    %24 = arith.subf %23, %22 : vector<8x15xf32>
    %25 = math.exp %24 : vector<8x15xf32>
    %26 = arith.mulf %15, %25 : vector<8x15xf32>
    %27 = vector.shape_cast %26 : vector<8x15xf32> to vector<1x8x15xf32>
    %cst_11 = arith.constant dense<0.000000e+00> : vector<1xf32>
    %28 = vector.multi_reduction <add>, %27, %cst_11 [1, 2] : vector<1x8x15xf32> to vector<1xf32>
    %29 = vector.shape_cast %28 : vector<1xf32> to vector<1x1x1xf32>
    %30 = vector.extract %29[0, 0, 0] : f32 from vector<1x1x1xf32>
    %31 = vector.broadcast %30 : f32 to vector<1x1xf32>
    %32 = vector.extract_strided_slice %1 {offsets = [0, 1, 0], sizes = [1, 7, 16], strides = [1, 1, 1]} : vector<1x8x16xf32> to vector<1x7x16xf32>
    %33 = vector.extract_strided_slice %1 {offsets = [0, 0, 0], sizes = [1, 7, 16], strides = [1, 1, 1]} : vector<1x8x16xf32> to vector<1x7x16xf32>
    %34 = arith.subf %32, %33 : vector<1x7x16xf32>
    %35 = math.absf %34 : vector<1x7x16xf32>
    %cst_12 = arith.constant dense<0.000000e+00> : vector<7x16xf32>
    %36 = vector.multi_reduction <add>, %35, %cst_12 [0] : vector<1x7x16xf32> to vector<7x16xf32>
    %37 = vector.extract_strided_slice %3 {offsets = [0, 1, 0], sizes = [3, 7, 16], strides = [1, 1, 1]} : vector<3x8x16xf32> to vector<3x7x16xf32>
    %38 = vector.extract_strided_slice %3 {offsets = [0, 0, 0], sizes = [3, 7, 16], strides = [1, 1, 1]} : vector<3x8x16xf32> to vector<3x7x16xf32>
    %39 = arith.subf %37, %38 : vector<3x7x16xf32>
    %40 = math.absf %39 : vector<3x7x16xf32>
    %cst_13 = arith.constant dense<0.000000e+00> : vector<7x16xf32>
    %41 = vector.multi_reduction <add>, %40, %cst_13 [0] : vector<3x7x16xf32> to vector<7x16xf32>
    %cst_14 = arith.constant 3.000000e+00 : f32
    %42 = vector.broadcast %cst_14 : f32 to vector<7x16xf32>
    %43 = arith.divf %41, %42 : vector<7x16xf32>
    %cst_15 = arith.constant 0.000000e+00 : f32
    %44 = vector.broadcast %cst_15 : f32 to vector<7x16xf32>
    %45 = arith.subf %44, %43 : vector<7x16xf32>
    %46 = math.exp %45 : vector<7x16xf32>
    %47 = arith.mulf %36, %46 : vector<7x16xf32>
    %48 = vector.shape_cast %47 : vector<7x16xf32> to vector<1x7x16xf32>
    %cst_16 = arith.constant dense<0.000000e+00> : vector<1xf32>
    %49 = vector.multi_reduction <add>, %48, %cst_16 [1, 2] : vector<1x7x16xf32> to vector<1xf32>
    %50 = vector.shape_cast %49 : vector<1xf32> to vector<1x1x1xf32>
    %51 = vector.extract %50[0, 0, 0] : f32 from vector<1x1x1xf32>
    %52 = vector.broadcast %51 : f32 to vector<1x1xf32>
    %c0_17 = arith.constant 0 : index
    %c0_18 = arith.constant 0 : index
    %53 = vector.load %arg6[%c0_17, %c0_18] : memref<1x16xf32, #tpu.memory_space<vmem>>, vector<1x16xf32>
    %54 = arith.subf %5, %53 : vector<1x16xf32>
    %55 = math.absf %54 : vector<1x16xf32>
    %cst_19 = arith.constant dense<0.000000e+00> : vector<16xf32>
    %56 = vector.multi_reduction <add>, %55, %cst_19 [0] : vector<1x16xf32> to vector<16xf32>
    %57 = vector.shape_cast %56 : vector<16xf32> to vector<1x16xf32>
    %c0_20 = arith.constant 0 : index
    %c0_21 = arith.constant 0 : index
    %58 = vector.load %arg7[%c0_20, %c0_21] : memref<3x16xf32, #tpu.memory_space<vmem>>, vector<3x16xf32>
    %59 = arith.subf %7, %58 : vector<3x16xf32>
    %60 = math.absf %59 : vector<3x16xf32>
    %cst_22 = arith.constant dense<0.000000e+00> : vector<16xf32>
    %61 = vector.multi_reduction <add>, %60, %cst_22 [0] : vector<3x16xf32> to vector<16xf32>
    %62 = vector.shape_cast %61 : vector<16xf32> to vector<1x16xf32>
    %cst_23 = arith.constant 3.000000e+00 : f32
    %63 = vector.broadcast %cst_23 : f32 to vector<1x16xf32>
    %64 = arith.divf %62, %63 : vector<1x16xf32>
    %cst_24 = arith.constant 0.000000e+00 : f32
    %65 = vector.broadcast %cst_24 : f32 to vector<1x16xf32>
    %66 = arith.subf %65, %64 : vector<1x16xf32>
    %67 = math.exp %66 : vector<1x16xf32>
    %68 = arith.mulf %57, %67 : vector<1x16xf32>
    %69 = vector.shape_cast %68 : vector<1x16xf32> to vector<1x1x16xf32>
    %cst_25 = arith.constant dense<0.000000e+00> : vector<1xf32>
    %70 = vector.multi_reduction <add>, %69, %cst_25 [1, 2] : vector<1x1x16xf32> to vector<1xf32>
    %71 = vector.shape_cast %70 : vector<1xf32> to vector<1x1x1xf32>
    %72 = vector.extract %71[0, 0, 0] : f32 from vector<1x1x1xf32>
    %73 = vector.broadcast %72 : f32 to vector<1x1xf32>
    %c0_26 = arith.constant 0 : index
    %c0_27 = arith.constant 0 : index
    %c0_28 = arith.constant 0 : index
    %74 = vector.load %arg4[%c0_26, %c0_27, %c0_28] : memref<1x1x1xf32, #tpu.memory_space<vmem>>, vector<1x1x1xf32>
    %75 = vector.shape_cast %31 : vector<1x1xf32> to vector<1x1x1xf32>
    %76 = arith.addf %74, %75 : vector<1x1x1xf32>
    %c0_29 = arith.constant 0 : index
    %c0_30 = arith.constant 0 : index
    %c0_31 = arith.constant 0 : index
    %77 = vector.load %arg4[%c0_29, %c0_30, %c0_31] : memref<1x1x1xf32, #tpu.memory_space<vmem>>, vector<1x1x1xf32>
    tpu.vector_store %arg4[%c0_29, %c0_30, %c0_31], %76 {strides = array<i32>} : memref<1x1x1xf32, #tpu.memory_space<vmem>>, vector<1x1x1xf32>,
    %c0_32 = arith.constant 0 : index
    %c0_33 = arith.constant 0 : index
    %c0_34 = arith.constant 0 : index
    %78 = vector.load %arg5[%c0_32, %c0_33, %c0_34] : memref<1x1x1xf32, #tpu.memory_space<vmem>>, vector<1x1x1xf32>
    %79 = arith.addf %52, %73 : vector<1x1xf32>
    %80 = vector.shape_cast %79 : vector<1x1xf32> to vector<1x1x1xf32>
    %81 = arith.addf %78, %80 : vector<1x1x1xf32>
    %c0_35 = arith.constant 0 : index
    %c0_36 = arith.constant 0 : index
    %c0_37 = arith.constant 0 : index
    %82 = vector.load %arg5[%c0_35, %c0_36, %c0_37] : memref<1x1x1xf32, #tpu.memory_space<vmem>>, vector<1x1x1xf32>
    tpu.vector_store %arg5[%c0_35, %c0_36, %c0_37], %81 {strides = array<i32>} : memref<1x1x1xf32, #tpu.memory_space<vmem>>, vector<1x1x1xf32>,
    %83 = vector.extract_strided_slice %1 {offsets = [0, 7, 0], sizes = [1, 1, 16], strides = [1, 1, 1]} : vector<1x8x16xf32> to vector<1x1x16xf32>
    %84 = vector.shape_cast %83 : vector<1x1x16xf32> to vector<1x16xf32>
    %c0_38 = arith.constant 0 : index
    %c0_39 = arith.constant 0 : index
    %85 = vector.load %arg6[%c0_38, %c0_39] : memref<1x16xf32, #tpu.memory_space<vmem>>, vector<1x16xf32>
    tpu.vector_store %arg6[%c0_38, %c0_39], %84 {strides = array<i32>} : memref<1x16xf32, #tpu.memory_space<vmem>>, vector<1x16xf32>,
    %86 = vector.extract_strided_slice %3 {offsets = [0, 7, 0], sizes = [3, 1, 16], strides = [1, 1, 1]} : vector<3x8x16xf32> to vector<3x1x16xf32>
    %87 = vector.shape_cast %86 : vector<3x1x16xf32> to vector<3x16xf32>
    %c0_40 = arith.constant 0 : index
    %c0_41 = arith.constant 0 : index
    %88 = vector.load %arg7[%c0_40, %c0_41] : memref<3x16xf32, #tpu.memory_space<vmem>>, vector<3x16xf32>
    tpu.vector_store %arg7[%c0_40, %c0_41], %87 {strides = array<i32>} : memref<3x16xf32, #tpu.memory_space<vmem>>, vector<3x16xf32>,
    return
  }
  func.func @transform_0(%arg0: i32, %arg1: i32) -> (i32, i32, i32, i32) {
    %c0_i32 = arith.constant 0 : i32
    %c0_i32_0 = arith.constant 0 : i32
    %c0_i32_1 = arith.constant 0 : i32
    return %arg0, %c0_i32, %arg1, %c0_i32_0 : i32, i32, i32, i32
  }
  func.func @transform_1(%arg0: i32, %arg1: i32) -> (i32, i32, i32, i32) {
    %c0_i32 = arith.constant 0 : i32
    %c0_i32_0 = arith.constant 0 : i32
    %c0_i32_1 = arith.constant 0 : i32
    return %arg0, %c0_i32, %arg1, %c0_i32_0 : i32, i32, i32, i32
  }
  func.func @transform_2(%arg0: i32, %arg1: i32) -> (i32, i32, i32) {
    %c0_i32 = arith.constant 0 : i32
    %c0_i32_0 = arith.constant 0 : i32
    %c0_i32_1 = arith.constant 0 : i32
    return %arg0, %c0_i32, %c0_i32_0 : i32, i32, i32
  }
  func.func @transform_3(%arg0: i32, %arg1: i32) -> (i32, i32, i32) {
    %c0_i32 = arith.constant 0 : i32
    %c0_i32_0 = arith.constant 0 : i32
    %c0_i32_1 = arith.constant 0 : i32
    return %arg0, %c0_i32, %c0_i32_0 : i32, i32, i32
  }
}

</mosaic_0001>

<bundles_post_ra>
// kernel: tpu_custom_call.1
= control target key start
LH: loop header
LB: loop body
LE: loop exit
PB: predicated region body
PF: predicated region fallthrough
CT: control target
= control target key end

     0   :  { %s1031_s0 = inlined_call_operand.hbm [shape: f32[2,1,16,16], index: 0, kind: input, shape index: {}]   ;;  %s1032_s1 = inlined_call_operand.hbm [shape: f32[2,3,16,16], index: 1, kind: input, shape index: {}]   ;;  %s1033_s2 = inlined_call_operand.vmem [shape: f32[2,1,1], index: 2, kind: output, shape index: {0}]   ;;  %s1034_s3 = inlined_call_operand.vmem [shape: f32[2,1,1], index: 3, kind: output, shape index: {1}]  }
   0x1   :  { %1035 = sst [smem:[#allocation10_spill]] %s1031_s0 }
   0x2   :  { %9 = vsyncpa [#allocation5], 0 }
   0x3   :  { %11 = vsyncpa [#allocation5 + $0x1], 0 }
   0x4   :  { %12 = vsyncpa [#allocation7], 0 }
   0x5   :  { %14 = vsyncpa [#allocation7 + $0x1], 0  ;;  %s830_s12 = smov 0   ;;  %s832_s13 = smov 0  }
   0x6   :  { %s834_s14 = smov 0   ;;  %s836_s15 = smov 0  }
   0x7   :  { %s838_s16 = smov 0   ;;  %s840_s17 = smov 0  }
   0x8   :  { %s842_s18 = smov 0   ;;  %s844_s19 = smov 0  }
   0x9 LB: > { %s564_s20 = sadd.s32 4294967295, %s800_s19   ;;  %s29_s21 = sadd.s32 1, %s792_s17  ;;  %s800_s19 = sphi %s844_s19, %s20_s19   ;;  %s796_s18 = sphi %s842_s18, %s1047_s18   ;;  %s792_s17 = sphi %s840_s17, %s1046_s17   ;;  %s788_s16 = sphi %s838_s16, %s1045_s16   ;;  %s784_s15 = sphi %s836_s15, %s1044_s15   ;;  %s780_s14 = sphi %s834_s14, %s1043_s14   ;;  %s776_s13 = sphi %s832_s13, %s1042_s13   ;;  %s772_s12 = sphi %s830_s12, %s1041_s12  }
   0xa   : > { %p30_p0 = scmp.ge.s32.totalorder %s29_s21, 2  ;;  %s32_s22 = sadd.s32 1, %s796_s18 }
   0xb   : > { %s41_s23 = sadd.s32 1, %s780_s14  ;;  %p48_p1 = scmp.ne.s32.totalorder %s780_s14, %s776_s13 }
   0xc   : > { %s1049_s21 = smov (%p30_p0, %s29_s21), 0  ;;  %s1051_s22 = smov (!%p30_p0, %s32_s22), %s796_s18 }
   0xd   : > { %s37_s24 = ssub.s32 %s792_s17, %s1049_s21  ;;  %p49_p2 = scmp.eq.s32.totalorder %s800_s19, 0 }
   0xe   : > { %p34_p3 = scmp.ge.s32.totalorder %s1051_s22, 2  ;;  %p54_p4 = scmp.ne.s32.totalorder %s776_s13, %s772_s12 }
   0xf   : > { %p881_p5 = por %p49_p2, %p48_p1  ;;  %p55_p6 = scmp.eq.s32.totalorder %s564_s20, 0 }
  0x10   : > { %s1053_s22 = smov (%p34_p3, %s1051_s22), 0  ;;  %p597_p8 = scmp.lt.s32.totalorder %s800_s19, 4 }
  0x11   : > { %p887_p7 = por %p55_p6, %p54_p4  ;;  %s36_s27 = ssub.s32 %s796_s18, %s1053_s22 }
  0x12   : > { %s38_s28 = sor.u32 %s37_s24, %s36_s27  ;;  %s895_s29 = sand.u32 1, %s780_s14  }
  0x13   : > { %p39_p9 = scmp.eq.s32.totalorder %s38_s28, 0  ;;  %s568_s30 = sshll.u32 %s895_s29, 3 }
  0x14   : > { %s569_s4 = sshll.u32 %s796_s18, 1  ;;  %s162_s8 = scalar_lea.vmem [#allocation4], %s568_s30 }
  0x15   : > { %s900_s5 = scalar_select %p39_p9, %s780_s14, %s41_s23  }
  0x16   : > { %s167_s6 = sadd.s32 %s792_s17, %s569_s4  ;;  %s171_s9 = sshll.u32 %s162_s8, 4  ;;  %s172_s9 = int_to_ptr.vmem [resolvable:$true] %s171_s9 }
  0x17   : > { %s570_s7 = sshll.u32 %s167_s6, 7  ;;  %s1038_s0 = sld [smem:[#allocation10_spill]] }
  0x18   : > { %p910_p10 = pnand %p597_p8, %p881_p5  ;;  %s577_s24 = smul.u32 24, %s895_s29 }
  0x19   : > { %p572_p11 = scmp.ge.s32.totalorder %s800_s19, 1  ;;  %s578_s23 = smul.u32 6, %s796_s18 }
  0x1a   : > { %s159_s27 = scalar_lea.sflag [#allocation5], %s895_s29  ;;  %p676_p12 = pneg %p910_p10 }
  0x1b   : > { %s687_s28 = scalar_lea.vmem %s172_s9, 128  ;;  %s802_s25 = smov [#allocation4]  }
  0x1c   : > { %p688_p13 = scmp.ne.s32.totalorder %s172_s9, %s687_s28  ;;  %s692_s30 = sshll.u32 %s802_s25, 4  ;;  %s693_s30 = int_to_ptr.vmem [resolvable:$false] %s692_s30 }
  0x1d   : > { %s169_s12 = scalar_lea.hbm %s1038_s0, %s570_s7  ;;  %s694_s4 = scalar_lea.vmem %s693_s30, 256 }
  0x1e   : > { %p690_p0 = pnand %p688_p13, %p676_p12  ;;  %p695_p2 = scmp.lt.s32.totalorder %s172_s9, %s693_s30 }
  0x1f   : > { %p696_p3 = scmp.lt.s32.totalorder %s694_s4, %s687_s28 }
  0x20   : > { %p691_p1 = pneg %p690_p0 }
  0x21   : > { %p697_p4 = por %p696_p3, %p695_p2 }
  0x23   : > { %p698_p5 = pnand %p697_p4, %p691_p1 }
  0x25   : > { %701 = shalt.err (!%p698_p5)
}
  0x26   : > { %593 = dma.hbm_to_vmem [thread:$0]  (!%p910_p10), %s169_s12, 128, %s172_s9, %s159_s27  }
  0x27   : > { %s187_s6 = sadd.s32 %s792_s17, %s578_s23  ;;  %p198_p6 = scmp.lt.s32.totalorder %s800_s19, 5 }
  0x28   : > { %s571_s7 = sshll.u32 %s187_s6, 7  ;;  %s182_s25 = scalar_lea.vmem [#allocation6], %s577_s24 }
  0x29   : > { %s189_s11 = scalar_lea.hbm %s1032_s1, %s571_s7  ;;  %s190_s28 = sshll.u32 %s182_s25, 4  ;;  %s191_s28 = int_to_ptr.vmem [resolvable:$true] %s190_s28 }
  0x2a   : > { %p932_p8 = pnand %p572_p11, %p198_p6  ;;  %s179_s4 = scalar_lea.sflag [#allocation7], %s895_s29 }
  0x2b   : > { %s715_s0 = scalar_lea.vmem %s191_s28, 384  ;;  %s803_s9 = smov [#allocation6]  }
  0x2c   : > { %p716_p9 = scmp.ne.s32.totalorder %s191_s28, %s715_s0  ;;  %s720_s12 = sshll.u32 %s803_s9, 4  ;;  %s721_s12 = int_to_ptr.vmem [resolvable:$false] %s720_s12 }
  0x2d   : > { %s722_s23 = scalar_lea.vmem %s721_s12, 768  ;;  %p723_p1 = scmp.lt.s32.totalorder %s191_s28, %s721_s12 }
  0x2e   : > { %p718_p13 = pnand %p716_p9, %p676_p12  ;;  %p724_p2 = scmp.lt.s32.totalorder %s722_s23, %s715_s0 }
  0x30   : > { %p719_p0 = pneg %p718_p13  ;;  %p725_p3 = por %p724_p2, %p723_p1 }
  0x32   : > { %p726_p4 = pnand %p725_p3, %p719_p0 }
  0x34   : > { %729 = shalt.err (!%p726_p4)
}
  0x35   : > { %s804_s24 = smov 256   ;;  %s805_s27 = smov 128  }
  0x36   : > { %s806_s6 = smov 8   ;;  %202 = sbr.rel (%p932_p8) target bundleno = 551 (0x227), region = 28 }
  0x37   : > { %596 = dma.hbm_to_vmem [thread:$0]  (!%p910_p10), %s189_s11, 384, %s191_s28, %s179_s4, %s804_s24, %s805_s27, %s806_s6  }
  0x38   : > { %s204_s29 = sand.u32 (!%p932_p8), 1, %s776_s13  }
  0x39   : > { %s573_s7 = sshll.u32 (!%p932_p8), %s204_s29, 3  ;;  %s205_s8 = scalar_lea.sflag (!%p932_p8), [#allocation5], %s204_s29 }
  0x3a   : > { %s208_s10 = scalar_lea.vmem (!%p932_p8), [#allocation4], %s573_s7 }
  0x3b   : > { %763 = dma.done.wait (%p887_p7), %s205_s8, 128  }
  0x3c   : > { %765 = vsyncadd (%p887_p7), %s205_s8, 4294967168  ;;  %s579_s0 = smul.u32 24, %s204_s29  ;;  %s214_s25 = scalar_lea.sflag [#allocation7], %s204_s29 }
  0x3e   : > { %s217_s9 = scalar_lea.vmem [#allocation6], %s579_s0 }
  0x3f   : > { %767 = dma.done.wait (%p887_p7), %s214_s25, 384  }
  0x40   : > { %769 = vsyncadd (%p887_p7), %s214_s25, 4294966912  ;;  %p246_p10 = scmp.lt.s32.totalorder %s788_s16, 1  ;;  %v965_v0 = vld [vmem:[%s208_s10] sm:$0xff]  ;;  %v969_v2 = vld [vmem:[%s217_s9 + $0x8] sm:$0xff]  ;;  %p574_p7 = scmp.ne.s32.totalorder %s784_s15, 0 }
  0x41   : > { %v967_v1 = vld [vmem:[%s217_s9] sm:$0xff]  ;;  %v971_v3 = vld [vmem:[%s217_s9 + $0x10] sm:$0xff] }
  0x42   : > { %s1055_s16 = smov (!%p246_p10, %s788_s16), 1  ;;  %259 = sbr.rel (%p574_p7) target bundleno = 76 (0x4c), region = 40 }
  0x43   : > { %s958_s28 = scalar_lea.vmem %s1033_s2, %s1055_s16  ;;  %s963_s12 = scalar_lea.vmem %s1034_s3, %s1055_s16 }
  0x47   : > { %vm260_vm0 = vcmask 0   ;;  %vm263_vm1 = vcmask 122880   ;;  %v268_v4 = vrot.slane %v969_v2, 7  ;;  %v807_v5 = vmov 0.0  }
  0x48   : > { %261 = vst.msk [vmem:[%s958_s28] sm:$0x1] %vm260_vm0, %v807_v5  ;;  %262 = vst.msk [vmem:[%s963_s12] sm:$0x1] %vm260_vm0, %v807_v5  ;;  %vm269_vm2 = vcmask 1041409   ;;  %v271_v6 = vrot.slane %v971_v3, 6 }
  0x49   : > { %264 = vst.msk [vmem:[#allocation2] sm:$0x1] %vm263_vm1, %v965_v0  ;;  %vm272_vm3 = vcmask 1042434   ;;  %vm275_vm4 = vcmask 124928   ;;  %v270_v7 = vsel %vm269_vm2, %v268_v4, %v967_v1 }
  0x4a   : > { %v273_v8 = vsel %vm272_vm3, %v271_v6, %v270_v7 }
  0x4b   : > { %276 = vst.msk [vmem:[#allocation3] sm:$0x7] %vm275_vm4, %v273_v8 }
  0x4c PF: > { %s808_s15 = smov 1   ;;  %vm433_vm5 = vcmask 130055   ;;  %v335_v16 = vrot.slane %v969_v2, 7  ;;  %vm393_vm6 = vcmask 1041409   ;;  %v435_v17 = vrot.slane %v971_v3, 6  ;;  %s809_s16 = smov 127  }
  0x4d   : > { %287 = vrot.lane.b32.xlu0 %v967_v1, %s808_s15  ;;  %291 = vrot.lane.b32.xlu1 %v971_v3, %s808_s15  ;;  %vm440_vm7 = vcmask 123904   ;;  %vm396_vm8 = vcmask 1042434   ;;  %vm399_vm9 = vcmask 124928   ;;  %v334_v45 = vrot.slane %v967_v1, 7 }
  0x4e   : > { %v436_v21 = vsel %vm393_vm6, %v435_v17, %v335_v16  ;;  %vm302_vm10 = vcmask 130056   ;;  %v336_v50 = vrot.slane %v971_v3, 7  ;;  %v341_v55 = vsub.f32 %v969_v2, %v335_v16 }
  0x4f   : > { %v340_v51 = vsub.f32 %v967_v1, %v334_v45  ;;  %vm346_vm11 = vcmask 130049   ;;  %vm360_vm12 = vcmask 129024   ;;  %vm412_vm13 = vcmask 122880   ;;  %v424_v45 = vld [vmem:[%s958_s28] sm:$0x1] }
  0x50   : > { %v372_v13 = vld [vmem:[#allocation2] sm:$0x1]  ;;  %v342_v58 = vsub.f32 %v971_v3, %v336_v50  ;;  %v344_v60 = vand.u32 2147483647, %v341_v55  ;;  %vm318_vm14 = vcmask 121856   ;;  %vm427_vm15 = vcmask 0  }
  0x51   : > { %289 = vrot.lane.b32.xlu0 %v969_v2, %s808_s15  ;;  %278 = vrot.lane.b32.xlu1 %v965_v0, %s808_s15  ;;  %434 = vst.msk [vmem:[#allocation2 - $0x7] sm:$0x80] %vm433_vm5, %v965_v0  ;;  %v373_v36 = vsub.f32 %v965_v0, %v372_v13  ;;  %v343_v59 = vand.u32 2147483647, %v340_v51  ;;  %v429_v50 = vld [vmem:[%s963_s12] sm:$0x1] }
  0x52   : > { %v376_v9 = vld [vmem:[#allocation3] sm:$0x7]  ;;  %v345_v63 = vand.u32 2147483647, %v342_v58  ;;  %v348_v5 = vsel %vm346_vm11, %v344_v60, 0.0 }
  0x53   : > { %v378_v10 = vrot.slane %v376_v9, 1  ;;  %v379_v11 = vrot.slane %v376_v9, 2  ;;  %v383_v12 = vsub.f32 %v967_v1, %v376_v9  ;;  %439 = vst.msk [vmem:[#allocation3 - $0x7] sm:$0x80] %vm433_vm5, %v967_v1  ;;  %v374_v37 = vand.u32 2147483647, %v373_v36 }
  0x54   : > { %441 = vst.msk [vmem:[#allocation3 + $0x1] sm:$0x3] %vm440_vm7, %v436_v21  ;;  %v347_v4 = vsel %vm346_vm11, %v343_v59, 0.0  ;;  %v350_v7 = vsel %vm346_vm11, %v345_v63, 0.0 }
  0x55   : > { %v384_v14 = vsub.f32 %v969_v2, %v378_v10  ;;  %v385_v15 = vsub.f32 %v971_v3, %v379_v11  ;;  %v386_v18 = vand.u32 2147483647, %v383_v12 }
  0x57   : > { %v387_v19 = vand.u32 2147483647, %v384_v14  ;;  %v388_v20 = vand.u32 2147483647, %v385_v15  ;;  %v329_v15 = vrot.slane %v965_v0, 7 }
  0x59   : > { %v392_v22 = vrot.slane %v387_v19, 7  ;;  %v395_v23 = vrot.slane %v388_v20, 6  ;;  %v331_v16 = vsub.f32 %v965_v0, %v329_v15 }
  0x5b   : > { %v394_v24 = vsel %vm393_vm6, %v392_v22, %v386_v18  ;;  %v332_v17 = vand.u32 2147483647, %v331_v16 }
  0x5c   : > { %v397_v25 = vsel %vm396_vm8, %v395_v23, %v394_v24 }
  0x5d   : > { %v400_v26 = vsel %vm399_vm9, %v397_v25, 0.0 }
  0x5e   : > { %v401_v27 = vrot.slane %v400_v26, 4 }
  0x60   : > { %v402_v28 = vadd.f32 %v401_v27, %v400_v26 }
  0x62   : > { %v403_v29 = vrot.slane %v402_v28, 2 }
  0x64   : > { %v404_v30 = vadd.f32 %v403_v29, %v402_v28 }
  0x66   : > { %v405_v31 = vrot.slane %v404_v30, 1 }
  0x68   : > { %v406_v32 = vadd.f32 %v405_v31, %v404_v30 }
  0x6a   : > { %v407_v33 = vmul.f32 0.33333334, %v406_v32 }
  0x6c   : > { %v408_v34 = vsub.f32 0.0, %v407_v33 }
  0x6e   : > { %v409_v35 = vmul.f32 1.442695, %v408_v34 }
  0x70   : > { %668 = vpow2.f32 %v409_v35 }
  0x7d   : > { %v669_v38 = vpop.eup %668 }
  0x7e   : > { %v411_v39 = vmul.f32 %v669_v38, %v374_v37 }
  0x80   : > { %v413_v22 = vsel %vm412_vm13, %v411_v39, 0.0 }
  0xbf   : > { %v288_v40 = vpop.permute.xlu0 %287  ;;  %v292_v41 = vpop.permute.xlu1 %291 }
  0xc0   : > { %v296_v42 = vsub.f32 %v967_v1, %v288_v40  ;;  %v298_v43 = vsub.f32 %v971_v3, %v292_v41  ;;  %v349_v1 = vadd.f32 %v348_v5, %v347_v4 }
  0xc2   : > { %v299_v46 = vand.u32 2147483647, %v296_v42  ;;  %v301_v48 = vand.u32 2147483647, %v298_v43  ;;  %v351_v9 = vadd.f32 %v350_v7, %v349_v1 }
  0xc3   : > { %v290_v44 = vpop.permute.xlu0 %289  ;;  %v279_v8 = vpop.permute.xlu1 %278 }
  0xc4   : > { %v297_v47 = vsub.f32 %v969_v2, %v290_v44  ;;  %v303_v52 = vsel %vm302_vm10, %v299_v46, 0.0  ;;  %v306_v54 = vsel %vm302_vm10, %v301_v48, 0.0  ;;  %v281_v2 = vsub.f32 %v965_v0, %v279_v8 }
  0xc5   : > { %v352_v10 = vmul.f32 0.33333334, %v351_v9 }
  0xc6   : > { %v300_v49 = vand.u32 2147483647, %v297_v47  ;;  %v282_v11 = vand.u32 2147483647, %v281_v2 }
  0xc7   : > { %v353_v12 = vsub.f32 0.0, %v352_v10 }
  0xc8   : > { %v304_v53 = vsel %vm302_vm10, %v300_v49, 0.0 }
  0xc9   : > { %v305_v56 = vadd.f32 %v304_v53, %v303_v52  ;;  %v354_v14 = vmul.f32 1.442695, %v353_v12 }
  0xcb   : > { %v307_v57 = vadd.f32 %v306_v54, %v305_v56 }
  0xcd   : > { %v309_v61 = vmul.f32 0.33333334, %v307_v57 }
  0xcf   : > { %v310_v62 = vsub.f32 0.0, %v309_v61 }
  0xd1   : > { %v311_v6 = vmul.f32 1.442695, %v310_v62 }
  0xd3   : > { %670 = vpow2.f32 %v311_v6 }
  0xd4   : > { %672 = vpow2.f32 %v354_v14 }
  0xe0   : > { %v671_v3 = vpop.eup %670 }
  0xe1   : > { %v313_v13 = vmul.f32 %v671_v3, %v282_v11  ;;  %v673_v18 = vpop.eup %672 }
  0xe2   : > { %v356_v19 = vmul.f32 %v673_v18, %v332_v17 }
  0xe3   : > { %315 = vrot.lane.b32.xlu0 %v313_v13, %s809_s16 }
  0xe4   : > { %v358_v20 = vrot.slane %v356_v19, 1 }
  0xe6   : > { %v361_v21 = vsel %vm360_vm12, %v358_v20, 0.0 }
 0x102   : > { %362 = vadd.xlane.f32.xlu0 %v361_v21 }
 0x106   : > { %414 = vadd.xlane.f32.xlu0 %v413_v22 }
 0x155   : > { %v316_v23 = vpop.permute.xlu0 %315 }
 0x156   : > { %v319_v24 = vsel %vm318_vm14, %v316_v23, 0.0 }
 0x157   : > { %320 = vadd.xlane.f32.xlu1 %v319_v24 }
 0x18b   : > { %v363_v25 = vpop.xlane.xlu0 %362 }
 0x18c   : > { %v364_v27 = vrot.slane %v363_v25, 4 }
 0x18e   : > { %v365_v29 = vadd.f32 %v364_v27, %v363_v25 }
 0x18f   : > { %v415_v26 = vpop.xlane.xlu0 %414 }
 0x190   : > { %v416_v28 = vrot.slane %v415_v26, 4  ;;  %v366_v30 = vrot.slane %v365_v29, 2 }
 0x192   : > { %v417_v0 = vadd.f32 %v416_v28, %v415_v26  ;;  %v367_v35 = vadd.f32 %v366_v30, %v365_v29 }
 0x194   : > { %v418_v32 = vrot.slane %v417_v0, 2  ;;  %v368_v39 = vrot.slane %v367_v35, 1 }
 0x196   : > { %v419_v36 = vadd.f32 %v418_v32, %v417_v0  ;;  %v369_v43 = vadd.f32 %v368_v39, %v367_v35 }
 0x198   : > { %v420_v41 = vrot.slane %v419_v36, 1 }
 0x19a   : > { %v421_v44 = vadd.f32 %v420_v41, %v419_v36 }
 0x1e0   : > { %v321_v31 = vpop.xlane.xlu1 %320 }
 0x1e1   : > { %v322_v33 = vrot.slane %v321_v31, 4 }
 0x1e3   : > { %v323_v34 = vadd.f32 %v322_v33, %v321_v31 }
 0x1e5   : > { %v324_v37 = vrot.slane %v323_v34, 2 }
 0x1e7   : > { %v325_v38 = vadd.f32 %v324_v37, %v323_v34 }
 0x1e9   : > { %v326_v40 = vrot.slane %v325_v38, 1 }
 0x1eb   : > { %v327_v42 = vadd.f32 %v326_v40, %v325_v38 }
 0x1ed   : > { %580 = vpush %v327_v42 }
 0x1ee   : > { %582 = vpush %v369_v43 }
 0x1ef   : > { %584 = vpush %v421_v44 }
 0x21e   : > { %s581_s26 = spop %580 }
 0x21f   : > { %v425_v46 = vstv %s581_s26  ;;  %s583_s23 = spop %582 }
 0x220   : > { %v426_v47 = vadd.f32 %v425_v46, %v424_v45  ;;  %v371_v48 = vstv %s583_s23  ;;  %s585_s24 = spop %584 }
 0x221   : > { %v423_v49 = vstv %s585_s24 }
 0x222   : > { %428 = vst.msk [vmem:[%s958_s28] sm:$0x1] %vm427_vm15, %v426_v47  ;;  %v430_v51 = vadd.f32 %v423_v49, %v371_v48 }
 0x224   : > { %v431_v52 = vadd.f32 %v430_v51, %v429_v50 }
 0x226   : > { %432 = vst.msk [vmem:[%s963_s12] sm:$0x1] %vm427_vm15, %v431_v52 }
 0x227 PF: > { %s20_s19 = sadd.s32 1, %s800_s19   ;;  %s1041_s12 = smov %s776_s13 }
 0x228   : > { %p17_p11 = scmp.ge.s32.totalorder %s20_s19, 6   ;;  %s1042_s13 = smov %s780_s14 }
 0x229   : > { %s1043_s14 = smov %s900_s5  ;;  %s1044_s15 = smov %s792_s17 }
 0x22a   : > { %s1045_s16 = smov %s796_s18  ;;  %s1046_s17 = smov %s1049_s21 }
 0x22b   : > { %s1047_s18 = smov %s1053_s22  ;;  %19 = sbr.rel (!%p17_p11) target bundleno = 9 (0x9), region = 97 }
 0x230   :  { %471 = vsyncpa [#allocation5], 1 }
 0x231   :  { %473 = vsyncpa [#allocation5 + $0x1], 1 }
 0x232   :  { %474 = vsyncpa [#allocation7], 1 }
 0x233   :  { %476 = vsyncpa [#allocation7 + $0x1], 1 }

</bundles_post_ra>
